<compile_context>
chip_gen: v5e
topology: v5e:2x2
jax: 0.10.0
libtpu: 0.0.40
codegen_flags: <defaults>
</compile_context>

<pallas_src>
import functools

import jax
import jax.numpy as jnp
from jax.experimental import pallas as pl
from jax.experimental.pallas import tpu as pltpu


def _round_up(x, m):
    return ((x + m - 1) // m) * m


# ----------------------------------------------------------------------------
# Pallas kernel: one fused (initial_z ∘ end_conv) matmul per row tile, in the
# transposed layout  out_T[c, r] = sum_k W_T[c, k] * x_T[k, r] + b[c].
#   x_ref   : (d_in,  rt)   rows (B*N) on the 128-lane axis
#   w_ref   : (C_pad, d_in) folded weight, channels on sublanes (C_pad = 8)
#   b_ref   : (C_pad, 1)    folded bias (broadcast along lanes)
#   out_ref : (C_pad, rt)   lane-dense f32 stores
# ----------------------------------------------------------------------------
def _gssg_kernel(x_ref, w_ref, b_ref, out_ref):
    out_ref[...] = (
        jnp.dot(w_ref[...], x_ref[...], preferred_element_type=jnp.float32)
        + b_ref[...])


def gssg_forward(times, coeffs, rw_adj_in, rw_adj_out, params, *,
                 horizon, output_dim, num_nodes, row_tile=None):
    """Pallas implementation of GSSG.forward (CDE solve stubbed, see TODO)."""
    del times, rw_adj_in, rw_adj_out  # only consumed by the external cdeint.

    # NaturalCubicSpline.evaluate(times[0]): first knot, zero fractional part
    # -> just the constant spline coefficient at index 0.
    coeff_a = coeffs[0]                               # (B, N, T-1, D_in)
    x0 = coeff_a[:, :, 0, :]                          # (B, N, D_in)
    B, N, d_in = x0.shape
    assert N == num_nodes
    R = B * N

    W_z, b_z = params["W_z"], params["b_z"]           # (D_in, H), (H,)
    W_c, b_c = params["W_c"], params["b_c"]           # (H, C_out), (C_out,)
    C_out = W_c.shape[1]
    assert C_out == horizon * output_dim

    # Fold initial_z -> end_conv into one tiny effective linear map (f32).
    W_eff = W_z @ W_c                                 # (D_in, C_out)
    b_eff = b_z @ W_c + b_c                           # (C_out,)

    # Channel axis padded only to the f32 sublane quantum (8), not 128 lanes.
    C_pad = _round_up(C_out, 8)
    w_t = jnp.zeros((C_pad, d_in), jnp.float32).at[:C_out, :].set(
        W_eff.T.astype(jnp.float32))
    b_t = jnp.zeros((C_pad, 1), jnp.float32).at[:C_out, 0].set(
        b_eff.astype(jnp.float32))

    # Row tiling: rows go on the 128-lane axis.  Default = exactly two large
    # parallel tiles so v7x's two TensorCores each get one; a 2-step grid is
    # equally fine (near-zero overhead) on v5e / v6e.
    if row_tile is None:
        rt = _round_up(pl.cdiv(R, 2), 128)
        grid_len = 2
    else:
        rt = max(128, _round_up(row_tile, 128))
        grid_len = pl.cdiv(R, rt)
    R_pad = grid_len * rt

    # Transposed input x0_T (d_in, R_pad), kept in f32.  This tiny wrapper-side
    # slice+transpose (<1 MB) is the price for lane-dense output stores inside
    # the kernel; padded columns beyond R yield bias-only rows, sliced off
    # below.
    x0_t = x0.reshape(R, d_in).astype(jnp.float32).T  # (d_in, R)
    if R_pad != R:
        x0_t = jnp.pad(x0_t, ((0, 0), (0, R_pad - R)))

    out_t = pl.pallas_call(
        _gssg_kernel,
        out_shape=jax.ShapeDtypeStruct((C_pad, R_pad), jnp.float32),
        grid=(grid_len,),
        in_specs=[
            pl.BlockSpec((d_in, rt), lambda i: (0, i)),     # x0_T row tile
            pl.BlockSpec((C_pad, d_in), lambda i: (0, 0)),  # folded weight^T
            pl.BlockSpec((C_pad, 1), lambda i: (0, 0)),     # folded bias
        ],
        out_specs=pl.BlockSpec((C_pad, rt), lambda i: (0, i)),
        compiler_params=pltpu.CompilerParams(
            dimension_semantics=("parallel",)),
    )(x0_t, w_t, b_t)

    # Strip padding and match PyTorch post-processing:
    # out[b, t, n, o] = out_t[t*output_dim + o, b*N + n].
    out = out_t[:C_out, :R].reshape(horizon, output_dim, B, N)
    out = out.transpose(2, 0, 3, 1)                   # (B, horizon, N, out_dim)
    return out


# ----------------------------------------------------------------------------
# Deterministic parameter construction (shapes implied by GSSG.__init__).
# ----------------------------------------------------------------------------
def init_params(key, *, num_nodes, embed_dim, input_dim, hidden_dim,
                output_dim, horizon):
    ks = jax.random.split(key, 8)
    c_out = horizon * output_dim
    return {
        # nn.Parameter(torch.randn(num_node, embed_dim)) — only consumed by the
        # external fusion_f, kept for structural fidelity.
        "node_embeddings": jax.random.normal(ks[0], (num_nodes, embed_dim), jnp.float32),
        # initial_h : Linear(input_dim, hidden_dim) — only feeds the external
        # CDE solver, unused while cdeint is stubbed.
        "W_h": jax.random.normal(ks[1], (input_dim, hidden_dim), jnp.float32) * 0.1,
        "b_h": jax.random.normal(ks[2], (hidden_dim,), jnp.float32) * 0.1,
        # initial_z : Linear(input_dim, hidden_dim), stored transposed.
        "W_z": jax.random.normal(ks[3], (input_dim, hidden_dim), jnp.float32) * 0.1,
        "b_z": jax.random.normal(ks[4], (hidden_dim,), jnp.float32) * 0.1,
        # end_conv: Conv2d(1, horizon*output_dim, kernel=(1, hidden_dim)) ->
        # weight (c_out, 1, 1, hidden_dim) stored transposed as (hidden_dim, c_out).
        "W_c": jax.random.normal(ks[5], (hidden_dim, c_out), jnp.float32) * 0.1,
        "b_c": jax.random.normal(ks[6], (c_out,), jnp.float32) * 0.1,
    }


if __name__ == "__main__":
    # Small, self-consistent config.
    batch = 2
    num_nodes = 8
    input_dim = 4          # input_channels
    hidden_dim = 32        # hidden_channels
    output_dim = 2         # output_channels
    horizon = 3
    embed_dim = 8
    n_times = 8

    key = jax.random.PRNGKey(0)
    k_par, k_a, k_b, k_c, k_d, k_in, k_out = jax.random.split(key, 7)

    params = init_params(k_par, num_nodes=num_nodes, embed_dim=embed_dim,
                         input_dim=input_dim, hidden_dim=hidden_dim,
                         output_dim=output_dim, horizon=horizon)

    times = jnp.linspace(0.0, 1.0, n_times, dtype=jnp.float32)
    # Natural-cubic-spline coefficient tuple (a, b, two_c, three_d),
    # each (batch, num_nodes, n_times - 1, input_dim).
    cshape = (batch, num_nodes, n_times - 1, input_dim)
    coeffs = (
        jax.random.normal(k_a, cshape, jnp.float32),
        jax.random.normal(k_b, cshape, jnp.float32),
        jax.random.normal(k_c, cshape, jnp.float32),
        jax.random.normal(k_d, cshape, jnp.float32),
    )
    rw_adj_in = jax.nn.softmax(jax.random.normal(k_in, (num_nodes, num_nodes)), axis=-1)
    rw_adj_out = jax.nn.softmax(jax.random.normal(k_out, (num_nodes, num_nodes)), axis=-1)

    fwd = functools.partial(gssg_forward, horizon=horizon,
                            output_dim=output_dim, num_nodes=num_nodes)
    out = fwd(times, coeffs, rw_adj_in, rw_adj_out, params)
    out = jax.block_until_ready(out)
    assert out.shape == (batch, horizon, num_nodes, output_dim), out.shape

    # Reference check against the same (stubbed-CDE) math in plain JAX/f32.
    x0 = coeffs[0][:, :, 0, :].reshape(batch * num_nodes, input_dim)
    ref = (x0 @ (params["W_z"] @ params["W_c"])
           + (params["b_z"] @ params["W_c"] + params["b_c"]))
    ref = ref.reshape(batch, num_nodes, horizon, output_dim).transpose(0, 2, 1, 3)
    assert jnp.allclose(out, ref, atol=1e-5, rtol=1e-5)
    print("KERNEL_OK")
</pallas_src>

<mosaic_0001>
module attributes {stable_mosaic.version = 11 : i64} {
  func.func @_gssg_kernel(%arg0: i32, %arg1: memref<4x128xf32, #tpu.memory_space<vmem>>, %arg2: memref<8x4xf32, #tpu.memory_space<vmem>>, %arg3: memref<8x1xf32, #tpu.memory_space<vmem>>, %arg4: memref<8x128xf32, #tpu.memory_space<vmem>>) attributes {dimension_semantics = [#tpu.dimension_semantics<parallel>], iteration_bounds = array<i64: 2>, scalar_prefetch = 0 : i64, scratch_operands = 0 : i64, tpu.core_type = #tpu.core_type<tc>, window_params = [{transform_indices = @transform_0, window_bounds = array<i64: 4, 128>}, {pipeline_mode = #tpu.pipeline_mode<synchronous>, transform_indices = @transform_1, window_bounds = array<i64: 8, 4>}, {pipeline_mode = #tpu.pipeline_mode<synchronous>, transform_indices = @transform_2, window_bounds = array<i64: 8, 1>}, {transform_indices = @transform_3, window_bounds = array<i64: 8, 128>}]} {
    %c0 = arith.constant 0 : index
    %c0_0 = arith.constant 0 : index
    %0 = vector.load %arg2[%c0, %c0_0] : memref<8x4xf32, #tpu.memory_space<vmem>>, vector<8x4xf32>
    %c0_1 = arith.constant 0 : index
    %c0_2 = arith.constant 0 : index
    %1 = vector.load %arg1[%c0_1, %c0_2] : memref<4x128xf32, #tpu.memory_space<vmem>>, vector<4x128xf32>
    %cst = arith.constant dense<0.000000e+00> : vector<8x128xf32>
    %2 = tpu.matmul %0, %1, %cst {dimension_numbers = #tpu.dot_dimension_numbers<[1], [0], [0], [1], [0, 0, 1, 1], [], []>} : vector<8x4xf32>, vector<4x128xf32>, vector<8x128xf32> -> vector<8x128xf32>
    %c0_3 = arith.constant 0 : index
    %c0_4 = arith.constant 0 : index
    %3 = vector.load %arg3[%c0_3, %c0_4] : memref<8x1xf32, #tpu.memory_space<vmem>>, vector<8x1xf32>
    %4 = vector.broadcast %3 : vector<8x1xf32> to vector<8x128xf32>
    %5 = arith.addf %2, %4 : vector<8x128xf32>
    %c0_5 = arith.constant 0 : index
    %c0_6 = arith.constant 0 : index
    %6 = vector.load %arg4[%c0_5, %c0_6] : memref<8x128xf32, #tpu.memory_space<vmem>>, vector<8x128xf32>
    tpu.vector_store %arg4[%c0_5, %c0_6], %5 {strides = array<i32>} : memref<8x128xf32, #tpu.memory_space<vmem>>, vector<8x128xf32>,
    return
  }
  func.func @transform_0(%arg0: i32) -> (i32, i32) {
    %c0_i32 = arith.constant 0 : i32
    %c0_i32_0 = arith.constant 0 : i32
    return %c0_i32, %arg0 : i32, i32
  }
  func.func @transform_1(%arg0: i32) -> (i32, i32) {
    %c0_i32 = arith.constant 0 : i32
    %c0_i32_0 = arith.constant 0 : i32
    %c0_i32_1 = arith.constant 0 : i32
    return %c0_i32, %c0_i32_0 : i32, i32
  }
  func.func @transform_2(%arg0: i32) -> (i32, i32) {
    %c0_i32 = arith.constant 0 : i32
    %c0_i32_0 = arith.constant 0 : i32
    %c0_i32_1 = arith.constant 0 : i32
    return %c0_i32, %c0_i32_0 : i32, i32
  }
  func.func @transform_3(%arg0: i32) -> (i32, i32) {
    %c0_i32 = arith.constant 0 : i32
    %c0_i32_0 = arith.constant 0 : i32
    return %c0_i32, %arg0 : i32, i32
  }
}

</mosaic_0001>

<bundles_post_ra>
// kernel: tpu_custom_call.1
= control target key start
LH: loop header
LB: loop body
LE: loop exit
PB: predicated region body
PF: predicated region fallthrough
CT: control target
= control target key end

     0   :  { %8 = vsyncpa [#allocation3], 0  ;;  %s507_s0 = inlined_call_operand.vmem [shape: f32[4,256], index: 0, kind: input, shape index: {}]   ;;  %s508_s1 = inlined_call_operand.vmem [shape: f32[8,4], index: 1, kind: input, shape index: {}]   ;;  %s509_s2 = inlined_call_operand.vmem [shape: f32[8,1], index: 2, kind: input, shape index: {}]   ;;  %s510_s3 = inlined_call_operand.hbm [shape: f32[8,256], index: 3, kind: output, shape index: {}]  }
   0x1   :  { %10 = vsyncpa [#allocation3 + $0x1], 0  ;;  %s416_s12 = smov 0   ;;  %s418_s13 = smov 0  }
   0x2   :  { %s420_s14 = smov 0   ;;  %s422_s15 = smov 0  }
   0x3 LB: > { %s437_s16 = sadd.s32 4294967295, %s393_s15   ;;  %s278_s17 = sadd.s32 4294967294, %s393_s15   ;;  %s393_s15 = sphi %s422_s15, %s516_s15   ;;  %s389_s14 = sphi %s420_s14, %s515_s14   ;;  %s385_s13 = sphi %s418_s13, %s514_s13   ;;  %s381_s12 = sphi %s416_s12, %s513_s12  }
   0x4   : > { %s441_s18 = sadd.s32 1, %s393_s15   ;;  %s91_s19 = sadd.s32 1, %s389_s14 }
   0x5   : > { %s88_s20 = ssub.s32 %s393_s15, %s441_s18  ;;  %p101_p0 = scmp.ne.s32.totalorder %s389_s14, %s385_s13 }
   0x6   : > { %p89_p1 = scmp.eq.s32.totalorder %s88_s20, 0  ;;  %p102_p2 = scmp.eq.s32.totalorder %s437_s16, 1 }
   0x7   : > { %p107_p3 = scmp.ne.s32.totalorder %s385_s13, %s381_s12  ;;  %p108_p4 = scmp.eq.s32.totalorder %s278_s17, 1 }
   0x8   : > { %s452_s21 = scalar_select %p89_p1, %s389_s14, %s91_s19  }
   0x9   : > { %p454_p5 = por %p102_p2, %p101_p0  ;;  %p458_p6 = por %p108_p4, %p107_p3 }
   0xa   : > { %p281_p7 = scmp.ge.s32.totalorder %s393_s15, 1  ;;  %p139_p8 = scmp.lt.s32.totalorder %s393_s15, 3 }
   0xc   : > { %p140_p9 = pnand %p281_p7, %p139_p8 }
   0xd   : > { %p162_p10 = scmp.lt.s32.totalorder (!%p140_p9), %s437_s16, 1  ;;  %s159_s6 = sand.u32 (!%p140_p9), 1, %s385_s13  }
   0xe   : > { %143 = sbr.rel (%p140_p9) target bundleno = 156 (0x9c), region = 32  ;;  %s282_s7 = sshll.u32 (!%p140_p9), %s159_s6, 3 }
   0xf   : > { %s287_s8 = sshll.u32 (!%p140_p9), %s437_s16, 3  ;;  %s161_s17 = scalar_lea.vmem (!%p140_p9), [#allocation2], %s282_s7 }
  0x10   : > { %s214_s11 = scalar_lea.hbm (!%p140_p9), %s510_s3, %s287_s8  ;;  %s216_s19 = sshll.u32 (!%p140_p9), %s161_s17, 4  ;;  %s217_s19 = int_to_ptr.vmem [resolvable:$true] %s216_s19 }
  0x11   : > { %s218_s20 = sshll.u32 (!%p140_p9), %s214_s11, 4  ;;  %s204_s24 = scalar_lea.sflag (!%p140_p9), [#allocation3], %s159_s6  ;;  %s219_s20 = int_to_ptr.hbm [resolvable:$true] %s218_s20 }
  0x12   : > { %s345_s25 = sshra.s32 (!%p140_p9), %s219_s20, 4  ;;  %s351_s28 = scalar_lea.hbm (!%p140_p9), %s510_s3, 16  ;;  %s346_s25 = int_to_ptr.hbm [resolvable:$true] %s345_s25 }
  0x13   : > { %v168_v0 = vld [vmem:[%s509_s2] sm:$0xff]  ;;  %v395_v1 = vmov 0   ;;  %s163_s26 = scalar_select %p162_p10, %s437_s16, 1  ;;  %vm178_vm0 = vcmask 1043456   ;;  %vm174_vm1 = vcmask 31744  }
  0x14   : > { %330 = vset.pattern.permute.xlu0 %v395_v1  ;;  %v166_v2 = vld [vmem:[%s508_s1] sm:$0xff]  ;;  %p352_p0 = scmp.lt.s32.totalorder %s346_s25, %s510_s3 }
  0x15   : > { %171 = vperm.xlu0 %330, %v168_v0   ;;  %s283_s27 = sshll.u32 %s163_s26, 2  ;;  %s347_s26 = scalar_lea.hbm %s346_s25, 8 }
  0x16   : > { %s165_s30 = scalar_lea.vmem %s507_s0, %s283_s27  ;;  %p348_p11 = scmp.ne.s32.totalorder %s346_s25, %s347_s26 }
  0x17   : > { %v167_v3 = vld [vmem:[%s165_s30] sm:$0xf]  ;;  %p353_p1 = scmp.lt.s32.totalorder %s351_s28, %s347_s26 }
  0x18   : > { %284 = vmatpush.msk.msra.mxu0 %vm178_vm0, %v167_v3  ;;  %p349_p12 = pnand %p348_p11, %p454_p5 }
  0x19   : > { %285 = vmatmul.msk.f32.vlgmr.msra.gmra.mxu0 %vm174_vm1, %v166_v2  ;;  %p354_p2 = por %p353_p1, %p352_p0 }
  0x1a   : > { %p350_p13 = pneg %p349_p12 }
  0x1c   : > { %p355_p3 = pnand %p354_p2, %p350_p13 }
  0x87   : > { %v172_v4 = vpop.permute.xlu0 %171 }
  0x96   : > { %v199_v5 = vpop.f32.mrf.mxu0 }
  0x97   : > { %v200_v6 = vadd.f32 %v199_v5, %v172_v4 }
  0x99   : > { %202 = vst [vmem:[%s161_s17] sm:$0xff] %v200_v6 }
  0x9a   : > { %358 = shalt.err (!%p355_p3)
}
  0x9b   : > { %290 = dma.vmem_to_hbm [thread:$0]  (%p454_p5), %s217_s19, 128, %s219_s20, %s204_s24  }
  0x9c PF: > { %p296_p4 = scmp.ge.s32.totalorder %s393_s15, 2  ;;  %s230_s4 = sand.u32 1, %s381_s12  }
  0x9d   : > { %s231_s5 = scalar_lea.sflag [#allocation3], %s230_s4 }
  0x9e   : > { %p293_p7 = pnand %p296_p4, %p458_p6 }
  0xa0   : > { %p294_p8 = pneg %p293_p7 }
  0xa2   : > { %376 = dma.done.wait (%p294_p8), %s231_s5, 128  }
  0xa3   : > { %378 = vsyncadd (%p294_p8), %s231_s5, 4294967168  ;;  %p13_p9 = scmp.ge.s32.totalorder %s441_s18, 4   ;;  %s513_s12 = smov %s385_s13 }
  0xa4   : > { %s514_s13 = smov %s389_s14  ;;  %s515_s14 = smov %s452_s21 }
  0xa5   : > { %s516_s15 = smov %s441_s18  ;;  %15 = sbr.rel (!%p13_p9) target bundleno = 3 (0x3), region = 67 }
  0xaa   :  { %237 = vsyncpa [#allocation3], 1 }
  0xab   :  { %239 = vsyncpa [#allocation3 + $0x1], 1 }

</bundles_post_ra>
